<compile_context>
chip_gen: v7x
topology: tpu7x:2x2x1
jax: 0.10.0
libtpu: 0.0.40
codegen_flags: <defaults>
</compile_context>

<pallas_src>
import functools

import jax
import jax.numpy as jnp
from jax import lax
from jax.experimental import pallas as pl
from jax.experimental.pallas import tpu as pltpu


def roberta_output_kernel(x_ref, w_ref, b_ref, res_ref, gamma_ref, beta_ref,
                          o_ref, *, eps):
    # x_ref:    (TM, I)  hidden_states tile (intermediate features)
    # w_ref:    (I, H)   dense weight, pre-transposed (VMEM-resident)
    # b_ref:    (1, H)   dense bias (resident)
    # res_ref:  (TM, H)  input_tensor (residual) tile
    # gamma_ref/beta_ref: (1, H) LayerNorm affine params (resident)
    # o_ref:    (TM, H)  output tile

    # MXU matmul on the native dtype (bf16 in, f32 accumulate).  Do NOT
    # up-cast the operands: that would force the slow multi-pass f32 MXU path.
    h = jnp.dot(x_ref[...], w_ref[...], preferred_element_type=jnp.float32)
    h = h + b_ref[...].astype(jnp.float32)

    # Dropout is identity at inference time.
    # TODO(synk): training-mode dropout (pltpu.prng_* + mask) not implemented.
    y = h + res_ref[...].astype(jnp.float32)

    # LayerNorm over the last (hidden) axis — two-pass f32 statistics
    # (E[(y-mean)^2]) to avoid one-pass cancellation; rsqrt goes to the EUP.
    mean = jnp.mean(y, axis=-1, keepdims=True)
    centered = y - mean
    var = jnp.mean(centered * centered, axis=-1, keepdims=True)
    inv = lax.rsqrt(var + eps)
    out = centered * inv
    out = out * gamma_ref[...].astype(jnp.float32) + beta_ref[...].astype(jnp.float32)

    o_ref[...] = out.astype(o_ref.dtype)


def _default_vmem_limit_bytes():
    """Explicit VMEM scoped limit: capacity - 8 MiB headroom, capped at 100 MiB.

    ~100 MiB on v5e/v6e (128 MiB physical), ~56 MiB on v7x (64 MiB physical).
    Returns None (use compiler default) if the hardware query fails.
    """
    try:
        cap = int(pltpu.get_tpu_info().vmem_capacity_bytes)
        return max(32 << 20, min(cap - (8 << 20), 100 << 20))
    except Exception:
        return None


def roberta_output(hidden_states, input_tensor, w_t, b, gamma, beta, eps,
                   *, tm=1024, vmem_limit_bytes=None):
    """hidden_states: (B, S, I); input_tensor: (B, S, H); w_t: (I, H).

    The token axis (B*S) is tiled with tile size `tm`; weight / bias /
    LayerNorm params stay VMEM-resident (single-buffered) across grid steps.
    Recommended `tm` with bf16 inputs: ~1024 on v7x (64 MiB VMEM; includes
    the f32 intermediates in the budget), 1024-2048 on v5e/v6e.
    """
    B, S, I = hidden_states.shape
    H = input_tensor.shape[-1]
    T = B * S

    # Clamp the token-tile size; keep it a multiple of 16 (bf16 sublane pack)
    # when it does not cover the full token axis.  No explicit padding: a
    # ragged final tile is handled by Pallas (output writes clipped to bounds).
    tm = min(int(tm), T)
    if tm < T:
        tm = max(16, (tm // 16) * 16)
    n_tiles = pl.cdiv(T, tm)

    x2d = hidden_states.reshape(T, I)
    res2d = input_tensor.reshape(T, H)
    b2d = b.reshape(1, H)
    g2d = gamma.reshape(1, H)
    be2d = beta.reshape(1, H)

    kernel = functools.partial(roberta_output_kernel, eps=float(eps))

    # Constant-index operands are never re-DMA'd -> single buffer is enough.
    resident = dict(pipeline_mode=pl.Buffered(1))

    dsize = jnp.dtype(hidden_states.dtype).itemsize
    cost = pl.CostEstimate(
        flops=2 * T * I * H,
        transcendentals=0,
        bytes_accessed=(T * I * dsize            # x in
                        + T * H * dsize          # residual in
                        + T * H * dsize          # out
                        + I * H * dsize          # weight
                        + 3 * H * dsize))        # bias, gamma, beta

    if vmem_limit_bytes is None:
        vmem_limit_bytes = _default_vmem_limit_bytes()
    cp_kwargs = dict(
        # Independent token tiles.  On v7x, verify in xprof that both
        # TensorCores are engaged; switch to pltpu.CORE_PARALLEL if not.
        dimension_semantics=("parallel",),
    )
    if vmem_limit_bytes is not None:
        cp_kwargs["vmem_limit_bytes"] = int(vmem_limit_bytes)

    out2d = pl.pallas_call(
        kernel,
        out_shape=jax.ShapeDtypeStruct((T, H), hidden_states.dtype),
        grid_spec=pltpu.PrefetchScalarGridSpec(
            num_scalar_prefetch=0,
            grid=(n_tiles,),
            in_specs=[
                pl.BlockSpec((tm, I), lambda i: (i, 0)),              # x: tiled
                pl.BlockSpec((I, H), lambda i: (0, 0), **resident),   # W: resident
                pl.BlockSpec((1, H), lambda i: (0, 0), **resident),   # bias
                pl.BlockSpec((tm, H), lambda i: (i, 0)),              # residual: tiled
                pl.BlockSpec((1, H), lambda i: (0, 0), **resident),   # gamma
                pl.BlockSpec((1, H), lambda i: (0, 0), **resident),   # beta
            ],
            out_specs=pl.BlockSpec((tm, H), lambda i: (i, 0)),
        ),
        compiler_params=pltpu.CompilerParams(**cp_kwargs),
        cost_estimate=cost,
    )(x2d, w_t, b2d, res2d, g2d, be2d)

    return out2d.reshape(B, S, H)


if __name__ == "__main__":
    # Small but lane-dense config (hidden is a multiple of 128 so output
    # stores are unmasked).  RoBERTa-base would be intermediate=3072,
    # hidden=768, layer_norm_eps=1e-5.
    B, S = 2, 16
    INTER, HIDDEN = 512, 128
    EPS = 1e-5
    DTYPE = jnp.bfloat16  # native MXU path with f32 accumulation

    key = jax.random.PRNGKey(0)
    k1, k2, k3, k4, k5, k6 = jax.random.split(key, 6)

    hidden_states = jax.random.normal(k1, (B, S, INTER), dtype=jnp.float32).astype(DTYPE)
    input_tensor = jax.random.normal(k2, (B, S, HIDDEN), dtype=jnp.float32).astype(DTYPE)

    # Synthetic parameters.  PyTorch nn.Linear weight is (hidden, intermediate);
    # it is stored pre-transposed as (intermediate, hidden) for the kernel.
    w_t = (jax.random.normal(k3, (INTER, HIDDEN), dtype=jnp.float32) * 0.02).astype(DTYPE)
    b = (jax.random.normal(k4, (HIDDEN,), dtype=jnp.float32) * 0.02).astype(DTYPE)
    gamma = (1.0 + 0.01 * jax.random.normal(k5, (HIDDEN,), dtype=jnp.float32)).astype(DTYPE)
    beta = (0.01 * jax.random.normal(k6, (HIDDEN,), dtype=jnp.float32)).astype(DTYPE)

    # tm=16 so this tiny demo (T=32 tokens) exercises a multi-step pipelined
    # grid; production shapes should use tm~1024 (v7x) / 1024-2048 (v5e/v6e).
    out = roberta_output(hidden_states, input_tensor, w_t, b, gamma, beta, EPS, tm=16)
    out = jax.block_until_ready(out)

    # Pure-JAX f32 reference on the same bf16 inputs.
    x32 = hidden_states.astype(jnp.float32)
    r32 = input_tensor.astype(jnp.float32)
    h_ref = x32 @ w_t.astype(jnp.float32) + b.astype(jnp.float32)
    y_ref = h_ref + r32
    mean = jnp.mean(y_ref, axis=-1, keepdims=True)
    var = jnp.mean((y_ref - mean) ** 2, axis=-1, keepdims=True)
    ref = ((y_ref - mean) / jnp.sqrt(var + EPS) * gamma.astype(jnp.float32)
           + beta.astype(jnp.float32))

    assert jnp.allclose(out.astype(jnp.float32), ref, atol=3e-2, rtol=3e-2), \
        "mismatch vs reference"

    print("KERNEL_OK")
</pallas_src>

<mosaic_0001>
module attributes {stable_mosaic.version = 11 : i64} {
  func.func @roberta_output_kernel(%arg0: i32, %arg1: memref<16x512xbf16, #tpu.memory_space<vmem>>, %arg2: memref<512x128xbf16, #tpu.memory_space<vmem>>, %arg3: memref<1x128xbf16, #tpu.memory_space<vmem>>, %arg4: memref<16x128xbf16, #tpu.memory_space<vmem>>, %arg5: memref<1x128xbf16, #tpu.memory_space<vmem>>, %arg6: memref<1x128xbf16, #tpu.memory_space<vmem>>, %arg7: memref<16x128xbf16, #tpu.memory_space<vmem>>) attributes {dimension_semantics = [#tpu.dimension_semantics<parallel>], iteration_bounds = array<i64: 2>, scalar_prefetch = 0 : i64, scratch_operands = 0 : i64, tpu.core_type = #tpu.core_type<tc>, window_params = [{transform_indices = @transform_0, window_bounds = array<i64: 16, 512>}, {pipeline_mode = #tpu.pipeline_mode<synchronous>, transform_indices = @transform_1, window_bounds = array<i64: 512, 128>}, {pipeline_mode = #tpu.pipeline_mode<synchronous>, transform_indices = @transform_2, window_bounds = array<i64: 1, 128>}, {transform_indices = @transform_3, window_bounds = array<i64: 16, 128>}, {pipeline_mode = #tpu.pipeline_mode<synchronous>, transform_indices = @transform_4, window_bounds = array<i64: 1, 128>}, {pipeline_mode = #tpu.pipeline_mode<synchronous>, transform_indices = @transform_5, window_bounds = array<i64: 1, 128>}, {transform_indices = @transform_6, window_bounds = array<i64: 16, 128>}]} {
    %c0 = arith.constant 0 : index
    %c0_0 = arith.constant 0 : index
    %0 = vector.load %arg1[%c0, %c0_0] : memref<16x512xbf16, #tpu.memory_space<vmem>>, vector<16x512xbf16>
    %c0_1 = arith.constant 0 : index
    %c0_2 = arith.constant 0 : index
    %1 = vector.load %arg2[%c0_1, %c0_2] : memref<512x128xbf16, #tpu.memory_space<vmem>>, vector<512x128xbf16>
    %cst = arith.constant dense<0.000000e+00> : vector<16x128xf32>
    %2 = tpu.matmul %0, %1, %cst {dimension_numbers = #tpu.dot_dimension_numbers<[1], [0], [0], [1], [0, 0, 1, 1], [], []>} : vector<16x512xbf16>, vector<512x128xbf16>, vector<16x128xf32> -> vector<16x128xf32>
    %c0_3 = arith.constant 0 : index
    %c0_4 = arith.constant 0 : index
    %3 = vector.load %arg3[%c0_3, %c0_4] : memref<1x128xbf16, #tpu.memory_space<vmem>>, vector<1x128xbf16>
    %4 = arith.extf %3 : vector<1x128xbf16> to vector<1x128xf32>
    %5 = vector.broadcast %4 : vector<1x128xf32> to vector<16x128xf32>
    %6 = arith.addf %2, %5 : vector<16x128xf32>
    %c0_5 = arith.constant 0 : index
    %c0_6 = arith.constant 0 : index
    %7 = vector.load %arg4[%c0_5, %c0_6] : memref<16x128xbf16, #tpu.memory_space<vmem>>, vector<16x128xbf16>
    %8 = arith.extf %7 : vector<16x128xbf16> to vector<16x128xf32>
    %9 = arith.addf %6, %8 : vector<16x128xf32>
    %cst_7 = arith.constant dense<0.000000e+00> : vector<16xf32>
    %10 = vector.multi_reduction <add>, %9, %cst_7 [1] : vector<16x128xf32> to vector<16xf32>
    %11 = vector.shape_cast %10 : vector<16xf32> to vector<16x1xf32>
    %cst_8 = arith.constant 1.280000e+02 : f32
    %12 = vector.broadcast %cst_8 : f32 to vector<16x1xf32>
    %13 = arith.divf %11, %12 : vector<16x1xf32>
    %14 = vector.broadcast %13 : vector<16x1xf32> to vector<16x128xf32>
    %15 = arith.subf %9, %14 : vector<16x128xf32>
    %16 = arith.mulf %15, %15 : vector<16x128xf32>
    %cst_9 = arith.constant dense<0.000000e+00> : vector<16xf32>
    %17 = vector.multi_reduction <add>, %16, %cst_9 [1] : vector<16x128xf32> to vector<16xf32>
    %18 = vector.shape_cast %17 : vector<16xf32> to vector<16x1xf32>
    %cst_10 = arith.constant 1.280000e+02 : f32
    %19 = vector.broadcast %cst_10 : f32 to vector<16x1xf32>
    %20 = arith.divf %18, %19 : vector<16x1xf32>
    %cst_11 = arith.constant 9.99999974E-6 : f32
    %21 = vector.broadcast %cst_11 : f32 to vector<16x1xf32>
    %22 = arith.addf %20, %21 : vector<16x1xf32>
    %23 = math.rsqrt %22 : vector<16x1xf32>
    %24 = vector.broadcast %23 : vector<16x1xf32> to vector<16x128xf32>
    %25 = arith.mulf %15, %24 : vector<16x128xf32>
    %c0_12 = arith.constant 0 : index
    %c0_13 = arith.constant 0 : index
    %26 = vector.load %arg5[%c0_12, %c0_13] : memref<1x128xbf16, #tpu.memory_space<vmem>>, vector<1x128xbf16>
    %27 = arith.extf %26 : vector<1x128xbf16> to vector<1x128xf32>
    %28 = vector.broadcast %27 : vector<1x128xf32> to vector<16x128xf32>
    %29 = arith.mulf %25, %28 : vector<16x128xf32>
    %c0_14 = arith.constant 0 : index
    %c0_15 = arith.constant 0 : index
    %30 = vector.load %arg6[%c0_14, %c0_15] : memref<1x128xbf16, #tpu.memory_space<vmem>>, vector<1x128xbf16>
    %31 = arith.extf %30 : vector<1x128xbf16> to vector<1x128xf32>
    %32 = vector.broadcast %31 : vector<1x128xf32> to vector<16x128xf32>
    %33 = arith.addf %29, %32 : vector<16x128xf32>
    %34 = arith.truncf %33 : vector<16x128xf32> to vector<16x128xbf16>
    %c0_16 = arith.constant 0 : index
    %c0_17 = arith.constant 0 : index
    %35 = vector.load %arg7[%c0_16, %c0_17] : memref<16x128xbf16, #tpu.memory_space<vmem>>, vector<16x128xbf16>
    tpu.vector_store %arg7[%c0_16, %c0_17], %34 {strides = array<i32>} : memref<16x128xbf16, #tpu.memory_space<vmem>>, vector<16x128xbf16>,
    return
  }
  func.func @transform_0(%arg0: i32) -> (i32, i32) {
    %c0_i32 = arith.constant 0 : i32
    %c0_i32_0 = arith.constant 0 : i32
    return %arg0, %c0_i32 : i32, i32
  }
  func.func @transform_1(%arg0: i32) -> (i32, i32) {
    %c0_i32 = arith.constant 0 : i32
    %c0_i32_0 = arith.constant 0 : i32
    %c0_i32_1 = arith.constant 0 : i32
    return %c0_i32, %c0_i32_0 : i32, i32
  }
  func.func @transform_2(%arg0: i32) -> (i32, i32) {
    %c0_i32 = arith.constant 0 : i32
    %c0_i32_0 = arith.constant 0 : i32
    %c0_i32_1 = arith.constant 0 : i32
    return %c0_i32, %c0_i32_0 : i32, i32
  }
  func.func @transform_3(%arg0: i32) -> (i32, i32) {
    %c0_i32 = arith.constant 0 : i32
    %c0_i32_0 = arith.constant 0 : i32
    return %arg0, %c0_i32 : i32, i32
  }
  func.func @transform_4(%arg0: i32) -> (i32, i32) {
    %c0_i32 = arith.constant 0 : i32
    %c0_i32_0 = arith.constant 0 : i32
    %c0_i32_1 = arith.constant 0 : i32
    return %c0_i32, %c0_i32_0 : i32, i32
  }
  func.func @transform_5(%arg0: i32) -> (i32, i32) {
    %c0_i32 = arith.constant 0 : i32
    %c0_i32_0 = arith.constant 0 : i32
    %c0_i32_1 = arith.constant 0 : i32
    return %c0_i32, %c0_i32_0 : i32, i32
  }
  func.func @transform_6(%arg0: i32) -> (i32, i32) {
    %c0_i32 = arith.constant 0 : i32
    %c0_i32_0 = arith.constant 0 : i32
    return %arg0, %c0_i32 : i32, i32
  }
}

</mosaic_0001>

<bundles_post_ra>
// kernel: tpu_custom_call.1
= control target key start
LH: loop header
LB: loop body
LE: loop exit
PB: predicated region body
PF: predicated region fallthrough
CT: control target
= control target key end

     0   :  { %s1573_s0 = inlined_call_operand.hbm [shape: bf16[32,512], index: 0, kind: input, shape index: {}]   ;;  %s1574_s1 = inlined_call_operand.hbm [shape: bf16[512,128], index: 1, kind: input, shape index: {}]   ;;  %s1575_s2 = inlined_call_operand.vmem [shape: bf16[1,128], index: 2, kind: input, shape index: {}]   ;;  %s1576_s3 = inlined_call_operand.hbm [shape: bf16[32,128], index: 3, kind: input, shape index: {}]   ;;  %s1577_s4 = inlined_call_operand.vmem [shape: bf16[1,128], index: 4, kind: input, shape index: {}]   ;;  %s1578_s5 = inlined_call_operand.vmem [shape: bf16[1,128], index: 5, kind: input, shape index: {}]   ;;  %s1579_s6 = inlined_call_operand.hbm [shape: bf16[32,128], index: 6, kind: output, shape index: {}]  }
   0x1   :  { %1584 = sst [smem:[#allocation14_spill]] %s1573_s0 }
   0x2   :  { %1585 = sst [smem:[#allocation15_spill]] %s1576_s3 }
   0x3   :  { %11 = vsyncpa [#allocation3], 0 }
   0x4   :  { %13 = vsyncpa [#allocation3 + $0x1], 0 }
   0x5   :  { %14 = vsyncpa [#allocation6], 0 }
   0x6   :  { %15 = vsyncpa [#allocation4], 0 }
   0x7   :  { %17 = vsyncpa [#allocation4 + $0x1], 0  ;;  %s1304_s21 = smov 0   ;;  %s1306_s22 = smov 0  }
   0x8   :  { %s1308_s23 = smov 0   ;;  %s1310_s24 = smov 0  }
   0x9 LB: > { %s1325_s25 = sadd.s32 1, %s1257_s24   ;;  %s30_s26 = sadd.s32 1, %s1253_s23  ;;  %s1257_s24 = sphi %s1310_s24, %s1606_s24   ;;  %s1253_s23 = sphi %s1308_s23, %s1605_s23   ;;  %s1249_s22 = sphi %s1306_s22, %s1604_s22   ;;  %s1245_s21 = sphi %s1304_s21, %s1603_s21  }
   0xa   : > { %s27_s27 = ssub.s32 %s1257_s24, %s1325_s25  ;;  %p37_p0 = scmp.ne.s32.totalorder %s1253_s23, %s1249_s22 }
   0xb   : > { %p28_p1 = scmp.eq.s32.totalorder %s27_s27, 0  ;;  %p38_p2 = scmp.eq.s32.totalorder %s1257_s24, 0 }
   0xc   : > { %p1011_p4 = scmp.lt.s32.totalorder %s1257_s24, 2  ;;  %s225_s29 = sand.u32 1, %s1257_s24  }
   0xd   : > { %s1336_s28 = scalar_select %p28_p1, %s1253_s23, %s30_s26  }
   0xe   : > { %p39_p5 = por %p38_p2, %p37_p0  ;;  %s227_s30 = sand.u32 1, %s1253_s23  }
   0xf   : > { %1586 = sst [smem:[#allocation13_spill]] %s1336_s28  ;;  %s871_s7 = sshll.u32 %s227_s30, 5 }
  0x10   : > { %s927_s8 = sshll.u32 %s1257_s24, 9  ;;  %s1587_s0 = sld [smem:[#allocation14_spill]] }
  0x11   : > { %s229_s12 = scalar_lea.vmem [#allocation2], %s871_s7  ;;  %p1351_p6 = pnand %p1011_p4, %p39_p5 }
  0x12   : > { %s237_s13 = sshll.u32 %s229_s12, 4  ;;  %s1357_s15 = scalar_lea.sflag [#allocation3], %s225_s29  ;;  %s1355_s13 = int_to_ptr.vmem [resolvable:$true] %s237_s13 }
  0x13   : > { %p1097_p8 = pneg %p1351_p6 }
  0x16   : > { %s1349_s11 = scalar_lea.hbm %s1587_s0, %s927_s8  ;;  %s1100_s19 = scalar_lea.hbm %s1587_s0, 1024 }
  0x17   : > { %s1095_s16 = scalar_lea.hbm %s1349_s11, 512  ;;  %p1101_p11 = scmp.lt.u32.totalorder %s1349_s11, %s1587_s0 }
  0x18   : > { %p1096_p7 = scmp.ne.s32.totalorder %s1349_s11, %s1095_s16  ;;  %p1102_p12 = scmp.lt.u32.totalorder %s1100_s19, %s1095_s16 }
  0x19   : > { %p1104_p1 = scmp.lt.u32.totalorder %s1095_s16, %s1349_s11 }
  0x1a   : > { %p1098_p9 = pnand %p1097_p8, %p1096_p7  ;;  %p1103_p13 = por %p1102_p12, %p1101_p11 }
  0x1c   : > { %p1099_p10 = pneg %p1098_p9  ;;  %p1105_p2 = por %p1104_p1, %p1103_p13 }
  0x1e   : > { %p1106_p4 = pnand %p1105_p2, %p1099_p10 }
  0x20   : > { %1109 = shalt.err (!%p1106_p4)
}
  0x21   : > { %s1110_s27 = scalar_lea.vmem %s1355_s13, 512  ;;  %s1259_s29 = smov [#allocation2]  }
  0x22   : > { %p1111_p5 = scmp.ne.s32.totalorder %s1355_s13, %s1110_s27  ;;  %s1115_s7 = sshll.u32 %s1259_s29, 4  ;;  %s1116_s7 = int_to_ptr.vmem [resolvable:$false] %s1115_s7 }
  0x23   : > { %s1117_s8 = scalar_lea.vmem %s1116_s7, 1024  ;;  %p1118_p3 = scmp.lt.s32.totalorder %s1355_s13, %s1116_s7 }
  0x24   : > { %p1113_p7 = pnand %p1111_p5, %p1097_p8  ;;  %p1119_p11 = scmp.lt.s32.totalorder %s1117_s8, %s1110_s27 }
  0x26   : > { %p1114_p9 = pneg %p1113_p7  ;;  %p1120_p12 = por %p1119_p11, %p1118_p3 }
  0x28   : > { %p1121_p13 = pnand %p1120_p12, %p1114_p9 }
  0x2a   : > { %1124 = shalt.err (!%p1121_p13)
}
  0x2b   : > { %s1260_s9 = smov 256   ;;  %s1261_s10 = smov 16  }
  0x2c   : > { %1002 = dma.hbm_to_vmem [thread:$0]  (!%p1351_p6), %s1349_s11, 512, %s1355_s13, %s1357_s15, %s1260_s9, %s1260_s9, %s1261_s10  }
  0x2d   : > { %s875_s12 = sshll.u32 %s227_s30, 3  ;;  %s1388_s18 = sadd.s32 4294967295, %s1257_s24  }
  0x2e   : > { %s251_s16 = scalar_lea.vmem [#allocation7], %s875_s12  ;;  %s867_s19 = sadd.s32 4294967294, %s1257_s24  }
  0x2f   : > { %s258_s17 = sshll.u32 %s251_s16, 4  ;;  %p43_p3 = scmp.ne.s32.totalorder %s1249_s22, %s1245_s21  ;;  %s1423_s17 = int_to_ptr.vmem [resolvable:$true] %s258_s17 }
  0x30   : > { %p1580_p10 = scmp.eq.s32.totalorder %s1388_s18, 0  ;;  %p177_p1 = scmp.eq.s32.totalorder %s1388_s18, 1 }
  0x31   : > { %p183_p2 = scmp.eq.s32.totalorder %s867_s19, 1  ;;  %p868_p4 = scmp.ge.s32.totalorder %s1257_s24, 1 }
  0x32   : > { %p1398_p5 = por %p1580_p10, %p43_p3  ;;  %p1405_p7 = por %p177_p1, %p37_p0 }
  0x33   : > { %p1409_p9 = por %p183_p2, %p43_p3  ;;  %p190_p11 = scmp.lt.s32.totalorder %s1257_s24, 3 }
  0x34   : > { %s1589_s11 = scalar_select %p1398_p5, 1, 0 }
  0x35   : > { %s1590_s30 = scalar_select %p1405_p7, 1, 0 }
  0x36   : > { %s1591_s13 = scalar_select %p1409_p9, 1, 0 }
  0x37   : > { %p1414_p12 = pnand %p868_p4, %p190_p11  ;;  %s1262_s26 = smov [#allocation5]  }
  0x38   : > { %s202_s27 = sshll.u32 %s1262_s26, 4  ;;  %s928_s29 = sshll.u32 %s1257_s24, 7  ;;  %s1418_s27 = int_to_ptr.vmem [resolvable:$true] %s202_s27 }
  0x39   : > { %s1592_s20 = scalar_select %p1414_p12, 1, 0 }
  0x3a   : > { %p995_p13 = pneg %p1414_p12  ;;  %s1594_s3 = sld [smem:[#allocation15_spill]] }
  0x3c   : > { %p1427_p0 = pnand %p995_p13, %p1580_p10 }
  0x40   : > { %s1434_s10 = scalar_lea.hbm %s1594_s3, %s928_s29  ;;  %s1130_s26 = scalar_lea.hbm %s1594_s3, 256 }
  0x41   : > { %s1125_s12 = scalar_lea.hbm %s1434_s10, 128  ;;  %p1131_p4 = scmp.lt.u32.totalorder %s1434_s10, %s1594_s3 }
  0x42   : > { %p1126_p3 = scmp.ne.s32.totalorder %s1434_s10, %s1125_s12  ;;  %p1132_p11 = scmp.lt.u32.totalorder %s1130_s26, %s1125_s12 }
  0x43   : > { %p1134_p10 = scmp.lt.u32.totalorder %s1125_s12, %s1434_s10 }
  0x44   : > { %p1128_p1 = pnand %p1126_p3, %p1097_p8  ;;  %p1133_p13 = por %p1132_p11, %p1131_p4 }
  0x46   : > { %p1129_p2 = pneg %p1128_p1  ;;  %p1135_p9 = por %p1134_p10, %p1133_p13 }
  0x48   : > { %p1136_p7 = pnand %p1135_p9, %p1129_p2 }
  0x4a   : > { %1139 = shalt.err (!%p1136_p7)
}
  0x4b   : > { %s1140_s29 = scalar_lea.vmem %s1423_s17, 128  ;;  %s1263_s8 = smov [#allocation7]  }
  0x4c   : > { %p1141_p3 = scmp.ne.s32.totalorder %s1423_s17, %s1140_s29  ;;  %s1145_s9 = sshll.u32 %s1263_s8, 4  ;;  %s1146_s9 = int_to_ptr.vmem [resolvable:$false] %s1145_s9 }
  0x4d   : > { %s1147_s0 = scalar_lea.vmem %s1146_s9, 256  ;;  %p1148_p12 = scmp.lt.s32.totalorder %s1423_s17, %s1146_s9 }
  0x4e   : > { %p1143_p1 = pnand %p1141_p3, %p1097_p8  ;;  %p1149_p4 = scmp.lt.s32.totalorder %s1147_s0, %s1140_s29 }
  0x50   : > { %p1144_p5 = pneg %p1143_p1  ;;  %p1150_p11 = por %p1149_p4, %p1148_p12 }
  0x52   : > { %p1151_p10 = pnand %p1150_p11, %p1144_p5 }
  0x54   : > { %1154 = shalt.err (!%p1151_p10)
}
  0x55   : > { %s1264_s28 = smov 64   ;;  %s1265_s12 = smov 4  }
  0x56   : > { %1005 = dma.hbm_to_vmem [thread:$0]  (!%p1351_p6), %s1434_s10, 128, %s1423_s17, %s1357_s15, %s1264_s28, %s1264_s28, %s1265_s12  }
  0x57   : > { %s1155_s26 = scalar_lea.hbm %s1574_s1, 4096  ;;  %p1157_p5 = pneg %p1427_p0 }
  0x58   : > { %p1156_p8 = scmp.ne.s32.totalorder %s1574_s1, %s1155_s26  ;;  %p1162_p12 = scmp.lt.u32.totalorder %s1155_s26, %s1574_s1 }
  0x5a   : > { %p1158_p7 = pnand %p1157_p5, %p1156_p8 }
  0x5c   : > { %p1159_p9 = pneg %p1158_p7 }
  0x5e   : > { %p1164_p2 = pnand %p1162_p12, %p1159_p9 }
  0x60   : > { %1167 = shalt.err (!%p1164_p2)
}
  0x61   : > { %s1168_s14 = scalar_lea.vmem %s1418_s27, 4096  ;;  %p1176_p1 = scmp.lt.s32.totalorder %s1418_s27, %s1418_s27 }
  0x62   : > { %p1169_p6 = scmp.ne.s32.totalorder %s1418_s27, %s1168_s14  ;;  %p1177_p4 = scmp.lt.s32.totalorder %s1168_s14, %s1168_s14 }
  0x64   : > { %p1171_p13 = pnand %p1169_p6, %p1157_p5  ;;  %p1178_p11 = por %p1177_p4, %p1176_p1 }
  0x66   : > { %p1172_p3 = pneg %p1171_p13 }
  0x68   : > { %p1179_p10 = pnand %p1178_p11, %p1172_p3 }
  0x6a   : > { %1182 = shalt.err (!%p1179_p10)
}
  0x6b   : > { %998 = dma.hbm_to_vmem [thread:$0]  (!%p1427_p0), %s1574_s1, 4096, %s1418_s27, [#allocation6], %s1264_s28, %s1264_s28, %s1265_s12  }
  0x6c   : > { %p1595_p8 = scmp.ne.s32.totalorder %s1592_s20, 0 }
  0x6d   : > { %s272_s17 = sand.u32 (!%p1595_p8), 1, %s1388_s18   ;;  %s1485_s10 = sand.u32 (!%p1595_p8), 1, %s1249_s22  }
  0x6e   : > { %270 = sbr.rel (%p1595_p8) target bundleno = 711 (0x2c7), region = 44  ;;  %s879_s0 = sshll.u32 (!%p1595_p8), %s1485_s10, 5 }
  0x6f   : > { %s273_s16 = scalar_lea.sflag (!%p1595_p8), [#allocation3], %s272_s17  ;;  %s1488_s19 = scalar_lea.vmem (!%p1595_p8), [#allocation2], %s879_s0 }
  0x70   : > { %p1596_p5 = scmp.ne.s32.totalorder (!%p1595_p8), %s1589_s11, 0 }
  0x75   : > { %1228 = dma.done.wait (%p1596_p5), %s273_s16, 512  }
  0x76   : > { %1230 = vsyncadd (%p1596_p5), %s273_s16, 4294966784  ;;  %p1597_p0 = scmp.eq.s32.totalorder %s1388_s18, 0 }
  0x78   : > { %1232 = dma.done.wait (%p1597_p0), [#allocation6], 4096   ;;  %p1598_p7 = pmov %p1597_p0 }
  0x79   : > { %s881_s20 = sshll.u32 %s1485_s10, 3 }
  0x7a   : > { %1234 = vsyncadd (%p1598_p7), [#allocation6], 4294963200  ;;  %s1501_s27 = scalar_lea.vmem [#allocation7], %s881_s20 }
  0x7b   : > { %1236 = dma.done.wait (%p1596_p5), %s273_s16, 128  }
  0x7c   : > { %1238 = vsyncadd (%p1596_p5), %s273_s16, 4294967168  ;;  %v1053_v0 = vld [vmem:[#allocation5 + $0x40] sm:$0xff]   ;;  %v1057_v4 = vld [vmem:[#allocation5 + $0x48] sm:$0xff]   ;;  %v397_v36 = vlaneseq  ;;  %s931_s29 = sshll.u32 %s1388_s18, 7  ;;  %s322_s9 = scalar_lea.vmem [#allocation8], %s881_s20 }
  0x7d   : > { %v1054_v1 = vld [vmem:[#allocation5 + $0xc0] sm:$0xff]   ;;  %941 = vmatprep.subr.bf16.mxu0 %v1053_v0  ;;  %v1058_v5 = vld [vmem:[#allocation5 + $0xc8] sm:$0xff]   ;;  %v1061_v8 = vld [vmem:[#allocation5 + $0x50] sm:$0xff]   ;;  %s764_s14 = sshll.u32 %s322_s9, 4  ;;  %s1527_s17 = scalar_lea.hbm %s1579_s6, %s931_s29  ;;  %s1529_s14 = int_to_ptr.vmem [resolvable:$true] %s764_s14 }
  0x7e   : > { %v1055_v2 = vld [vmem:[#allocation5] sm:$0xff]   ;;  %963 = vmatprep.subr.bf16.mxu1 %v1054_v1  ;;  %v1059_v6 = vld [vmem:[#allocation5 + $0x8] sm:$0xff]   ;;  %v1062_v9 = vld [vmem:[#allocation5 + $0xd0] sm:$0xff]   ;;  %v398_v37 = vshrl.u32 %v397_v36, 7  ;;  %s751_s0 = scalar_lea.sflag [#allocation4], %s1485_s10  ;;  %s1183_s16 = scalar_lea.vmem %s1529_s14, 128 }
  0x7f   : > { %v1056_v3 = vld [vmem:[#allocation5 + $0x80] sm:$0xff]   ;;  %942 = vmatpush3.bf16.msra.mxu0 %v1055_v2  ;;  %v1060_v7 = vld [vmem:[#allocation5 + $0x88] sm:$0xff]   ;;  %v1063_v10 = vld [vmem:[#allocation5 + $0x10] sm:$0xff]   ;;  %p1184_p9 = scmp.ne.s32.totalorder %s1529_s14, %s1183_s16  ;;  %p1599_p12 = scmp.ne.s32.totalorder %s1590_s30, 0 }
  0x80   : > { %964 = vmatpush3.bf16.msra.mxu1 %v1056_v3  ;;  %943 = vmatprep.subr.bf16.mxu0 %v1057_v4  ;;  %v1064_v11 = vld [vmem:[#allocation5 + $0x90] sm:$0xff]   ;;  %v1065_v12 = vld [vmem:[#allocation5 + $0x58] sm:$0xff]   ;;  %v1069_v16 = vld [vmem:[#allocation5 + $0x60] sm:$0xff]   ;;  %v399_v40 = vsub.s32 0, %v398_v37  ;;  %s1266_s18 = smov [#allocation8]  }
  0x81   : > { %965 = vmatprep.subr.bf16.mxu1 %v1058_v5  ;;  %v1066_v13 = vld [vmem:[#allocation5 + $0xd8] sm:$0xff]   ;;  %v1070_v17 = vld [vmem:[#allocation5 + $0xe0] sm:$0xff]   ;;  %v1073_v20 = vld [vmem:[#allocation5 + $0x68] sm:$0xff]   ;;  %p1185_p2 = pnand %p1184_p9, %p1599_p12 }
  0x82   : > { %v1067_v14 = vld [vmem:[#allocation5 + $0x18] sm:$0xff]   ;;  %v1071_v18 = vld [vmem:[#allocation5 + $0x20] sm:$0xff]   ;;  %v1074_v21 = vld [vmem:[#allocation5 + $0xe8] sm:$0xff]  }
  0x83   : > { %944 = vmatpush3.bf16.msra.mxu0 %v1059_v6  ;;  %v1068_v15 = vld [vmem:[#allocation5 + $0x98] sm:$0xff]   ;;  %v1072_v19 = vld [vmem:[#allocation5 + $0xa0] sm:$0xff]   ;;  %v1075_v22 = vld [vmem:[#allocation5 + $0x28] sm:$0xff]   ;;  %p1186_p6 = pneg %p1185_p2 }
  0x84   : > { %966 = vmatpush3.bf16.msra.mxu1 %v1060_v7  ;;  %945 = vmatprep.subr.bf16.mxu0 %v1061_v8  ;;  %v1076_v23 = vld [vmem:[#allocation5 + $0xa8] sm:$0xff]   ;;  %v1077_v24 = vld [vmem:[#allocation5 + $0x70] sm:$0xff]   ;;  %v1081_v28 = vld [vmem:[#allocation5 + $0x78] sm:$0xff]  }
  0x85   : > { %967 = vmatprep.subr.bf16.mxu1 %v1062_v9  ;;  %v1078_v25 = vld [vmem:[#allocation5 + $0xf0] sm:$0xff]   ;;  %v1082_v29 = vld [vmem:[#allocation5 + $0xf8] sm:$0xff]   ;;  %v395_v38 = vld [vmem:[%s1575_s2] sm:$0x1] }
  0x86   : > { %v1079_v26 = vld [vmem:[#allocation5 + $0x30] sm:$0xff]   ;;  %v1083_v30 = vld [vmem:[#allocation5 + $0x38] sm:$0xff]   ;;  %v396_v39 = vunpack.c.l.bf16 %v395_v38  ;;  %v933_v45 = vld [vmem:[%s1501_s27] sm:$0xff]  }
  0x87   : > { %946 = vmatpush3.bf16.msra.mxu0 %v1063_v10  ;;  %v1080_v27 = vld [vmem:[#allocation5 + $0xb0] sm:$0xff]   ;;  %v1084_v31 = vld [vmem:[#allocation5 + $0xb8] sm:$0xff]   ;;  %v934_v55 = vunpack.c.l.bf16 %v933_v45  ;;  %v935_v61 = vunpack.c.h.bf16 %v933_v45 }
  0x88   : > { %968 = vmatpush3.bf16.msra.mxu1 %v1064_v11  ;;  %947 = vmatprep.subr.bf16.mxu0 %v1065_v12  ;;  %v1085_v32 = vld [vmem:[%s1488_s19] ss:$16 sps:$4 sm:$0xff]   ;;  %v1087_v33 = vld [vmem:[%s1488_s19 + $0x4] ss:$16 sps:$4 sm:$0xff]   ;;  %v1088_v34 = vld [vmem:[%s1488_s19 + $0x8] ss:$16 sps:$4 sm:$0xff]   ;;  %v400_v42 = vrot.slane %v396_v39, %v399_v40 }
  0x89   : > { %969 = vmatprep.subr.bf16.mxu1 %v1066_v13  ;;  %v1090_v35 = vld [vmem:[%s1488_s19 + $0xc] ss:$16 sps:$4 sm:$0xff]   ;;  %645 = vmatprep.mubr.bf16.mxu0 %v1087_v33  ;;  %v724_v13 = vld [vmem:[%s1577_s4] sm:$0x1]  ;;  %s1187_s19 = sshll.u32 %s1266_s18, 4  ;;  %s1188_s19 = int_to_ptr.vmem [resolvable:$false] %s1187_s19 }
  0x8a   : > { %686 = vmatprep.mubr.bf16.mxu1 %v1090_v35  ;;  %s1189_s20 = scalar_lea.vmem %s1188_s19, 256  ;;  %p1190_p13 = scmp.lt.s32.totalorder %s1529_s14, %s1188_s19 }
  0x8b   : > { %948 = vmatpush3.bf16.msra.mxu0 %v1067_v14  ;;  %v725_v14 = vunpack.c.l.bf16 %v724_v13  ;;  %p1191_p3 = scmp.lt.s32.totalorder %s1189_s20, %s1183_s16 }
  0x8c   : > { %970 = vmatpush3.bf16.msra.mxu1 %v1068_v15  ;;  %949 = vmatprep.subr.bf16.mxu0 %v1069_v16  ;;  %v732_v15 = vld [vmem:[%s1578_s5] sm:$0x1] }
  0x8d   : > { %971 = vmatprep.subr.bf16.mxu1 %v1070_v17  ;;  %v729_v17 = vrot.slane %v725_v14, %v399_v40  ;;  %p1192_p1 = por %p1191_p3, %p1190_p13 }
  0x8f   : > { %950 = vmatpush3.bf16.msra.mxu0 %v1071_v18  ;;  %v733_v18 = vunpack.c.l.bf16 %v732_v15  ;;  %p1193_p4 = pnand %p1192_p1, %p1186_p6 }
  0x90   : > { %972 = vmatpush3.bf16.msra.mxu1 %v1072_v19  ;;  %951 = vmatprep.subr.bf16.mxu0 %v1073_v20 }
  0x91   : > { %973 = vmatprep.subr.bf16.mxu1 %v1074_v21  ;;  %v737_v21 = vrot.slane %v733_v18, %v399_v40 }
  0x93   : > { %952 = vmatpush3.bf16.msra.mxu0 %v1075_v22 }
  0x94   : > { %974 = vmatpush3.bf16.msra.mxu1 %v1076_v23  ;;  %953 = vmatprep.subr.bf16.mxu0 %v1077_v24 }
  0x95   : > { %975 = vmatprep.subr.bf16.mxu1 %v1078_v25 }
  0x97   : > { %954 = vmatpush3.bf16.msra.mxu0 %v1079_v26 }
  0x98   : > { %976 = vmatpush3.bf16.msra.mxu1 %v1080_v27  ;;  %955 = vmatprep.subr.bf16.mxu0 %v1081_v28 }
  0x99   : > { %977 = vmatprep.subr.bf16.mxu1 %v1082_v29 }
  0x9b   : > { %956 = vmatpush3.bf16.msra.mxu0 %v1083_v30 }
  0x9c   : > { %978 = vmatpush3.bf16.msra.mxu1 %v1084_v31 }
  0x9e   : > { %646 = vmatmul.mubr.bf16.vlgmr.msra.gmra.mrb[0].mxu0 %v1085_v32 }
  0x9f   : > { %687 = vmatmul.mubr.bf16.vlgmr.msra.gmra.mrb[0].mxu1 %v1088_v34 }
 0x171   : > { %v957_v41 = vpop.f32.mrb[0].mxu0 }
 0x172   : > { %v979_v43 = vpop.f32.mrb[0].mxu1  ;;  %v958_v44 = vpop.f32.mrb[1].mxu0 }
 0x173   : > { %v959_v46 = vadd.f32 %v958_v44, %v957_v41  ;;  %v980_v47 = vpop.f32.mrb[1].mxu1  ;;  %v960_v48 = vpop.f32.mrb[2].mxu0 }
 0x174   : > { %v981_v49 = vadd.f32 %v980_v47, %v979_v43  ;;  %v982_v50 = vpop.f32.mrb[2].mxu1  ;;  %v961_v51 = vpop.f32.mrb[3].mxu0 }
 0x175   : > { %v648_v52 = vadd.f32 %v959_v46, %v400_v42  ;;  %v962_v53 = vadd.f32 %v961_v51, %v960_v48  ;;  %v983_v54 = vpop.f32.mrb[3].mxu1 }
 0x176   : > { %v984_v56 = vadd.f32 %v983_v54, %v982_v50 }
 0x177   : > { %v689_v57 = vadd.f32 %v981_v49, %v648_v52  ;;  %v651_v58 = vadd.f32 %v962_v53, %v400_v42 }
 0x179   : > { %v692_v59 = vadd.f32 %v984_v56, %v651_v58  ;;  %v699_v60 = vadd.f32 %v934_v55, %v689_v57 }
 0x17b   : > { %701 = vadd.xlane.f32.xlu0 %v699_v60  ;;  %v700_v62 = vadd.f32 %v935_v61, %v692_v59 }
 0x17f   : > { %703 = vadd.xlane.f32.xlu0 %v700_v62 }
 0x208   : > { %v702_v63 = vpop.xlane.xlu0 %701 }
 0x209   : > { %v706_v0 = vmul.f32 0.0078125, %v702_v63 }
 0x20b   : > { %v708_v1 = vsub.f32 %v699_v60, %v706_v0 }
 0x20c   : > { %v704_v2 = vpop.xlane.xlu0 %703 }
 0x20d   : > { %v707_v3 = vmul.f32 0.0078125, %v704_v2  ;;  %v710_v4 = vmul.f32 %v708_v1, %v708_v1 }
 0x20f   : > { %v709_v5 = vsub.f32 %v700_v62, %v707_v3  ;;  %712 = vadd.xlane.f32.xlu1 %v710_v4 }
 0x211   : > { %v711_v6 = vmul.f32 %v709_v5, %v709_v5 }
 0x213   : > { %714 = vadd.xlane.f32.xlu1 %v711_v6 }
 0x29c   : > { %v713_v7 = vpop.xlane.xlu1 %712 }
 0x29d   : > { %v716_v8 = vmul.f32 0.0078125, %v713_v7 }
 0x29f   : > { %v718_v9 = vadd.f32 1e-05, %v716_v8 }
 0x2a0   : > { %v715_v10 = vpop.xlane.xlu1 %714 }
 0x2a1   : > { %1091 = vrsqrt.f32 %v718_v9  ;;  %v717_v11 = vmul.f32 0.0078125, %v715_v10 }
 0x2a3   : > { %v719_v12 = vadd.f32 1e-05, %v717_v11 }
 0x2a5   : > { %1093 = vrsqrt.f32 %v719_v12 }
 0x2ab   : > { %v1092_v16 = vpop.eup %1091 }
 0x2ac   : > { %v722_v19 = vmul.f32 %v1092_v16, %v708_v1 }
 0x2ae   : > { %v730_v22 = vmul.f32 %v729_v17, %v722_v19 }
 0x2af   : > { %v1094_v20 = vpop.eup %1093 }
 0x2b0   : > { %v723_v23 = vmul.f32 %v1094_v20, %v709_v5  ;;  %v738_v25 = vadd.f32 %v737_v21, %v730_v22 }
 0x2b2   : > { %v731_v24 = vmul.f32 %v729_v17, %v723_v23 }
 0x2b4   : > { %v739_v26 = vadd.f32 %v737_v21, %v731_v24 }
 0x2b6   : > { %v939_v27 = vpack.c.bf16 %v739_v26, %v738_v25 }
 0x2b8   : > { %940 = vst [vmem:[%s322_s9] sm:$0xff] %v939_v27  }
 0x2b9   : > { %1196 = shalt.err (!%p1193_p4)
}
 0x2ba   : > { %s1197_s27 = scalar_lea.hbm %s1527_s17, 128  ;;  %s1201_s28 = scalar_lea.hbm %s1579_s6, 256 }
 0x2bb   : > { %p1198_p11 = scmp.ne.s32.totalorder %s1527_s17, %s1197_s27  ;;  %p1202_p5 = scmp.lt.u32.totalorder %s1527_s17, %s1579_s6 }
 0x2bc   : > { %p1203_p0 = scmp.lt.u32.totalorder %s1201_s28, %s1197_s27  ;;  %p1205_p9 = scmp.lt.u32.totalorder %s1197_s27, %s1527_s17 }
 0x2bd   : > { %p1199_p10 = pnand %p1198_p11, %p1599_p12 }
 0x2be   : > { %p1204_p7 = por %p1203_p0, %p1202_p5 }
 0x2bf   : > { %p1200_p8 = pneg %p1199_p10 }
 0x2c0   : > { %p1206_p2 = por %p1205_p9, %p1204_p7 }
 0x2c2   : > { %p1207_p6 = pnand %p1206_p2, %p1200_p8 }
 0x2c4   : > { %1210 = shalt.err (!%p1207_p6)
}
 0x2c5   : > { %s1267_s8 = smov 64   ;;  %s1268_s29 = smov 4  }
 0x2c6   : > { %993 = dma.vmem_to_hbm [thread:$0]  (%p1599_p12), %s1529_s14, 128, %s1527_s17, %s751_s0, %s1267_s8, %s1267_s8, %s1268_s29  }
 0x2c7 PF: > { %s779_s9 = sand.u32 1, %s1245_s21   ;;  %p1600_p13 = scmp.ne.s32.totalorder %s1591_s13, 0 }
 0x2c8   : > { %p1601_p3 = scmp.ge.s32.totalorder %s1257_s24, 2  ;;  %s780_s3 = scalar_lea.sflag [#allocation4], %s779_s9 }
 0x2ca   : > { %p1007_p1 = pnand %p1601_p3, %p1600_p13 }
 0x2cc   : > { %1240 = dma.done.wait (!%p1007_p1), %s780_s3, 128  }
 0x2cd   : > { %1242 = vsyncadd (!%p1007_p1), %s780_s3, 4294967168  ;;  %s1602_s15 = sld [smem:[#allocation13_spill]]  ;;  %p20_p4 = scmp.ge.s32.totalorder %s1325_s25, 4  }
 0x2ce   : > { %s1603_s21 = smov %s1249_s22  ;;  %s1604_s22 = smov %s1253_s23 }
 0x2cf   : > { %s1606_s24 = smov %s1325_s25  ;;  %22 = sbr.rel (!%p20_p4) target bundleno = 9 (0x9), region = 104 }
 0x2d3   : > { %s1605_s23 = smov %s1602_s15 }
 0x2d6   :  { %785 = vsyncpa [#allocation3], 1 }
 0x2d7   :  { %787 = vsyncpa [#allocation3 + $0x1], 1 }
 0x2d8   :  { %788 = vsyncpa [#allocation6], 1 }
 0x2d9   :  { %789 = vsyncpa [#allocation4], 1 }
 0x2da   :  { %791 = vsyncpa [#allocation4 + $0x1], 1 }

</bundles_post_ra>
